<compile_context>
chip_gen: v7x
topology: tpu7x:2x2x1
jax: 0.10.0
libtpu: 0.0.40
codegen_flags: <defaults>
</compile_context>

<pallas_src>
import math

import jax
import jax.numpy as jnp
from jax.experimental import pallas as pl
from jax.experimental.pallas import tpu as pltpu


# ----------------------------------------------------------------------------
# Beta schedules (faithful port of the torch helpers)
# ----------------------------------------------------------------------------
def cosine_beta_schedule(timesteps, s=0.004):
    steps = timesteps + 1
    x = jnp.linspace(0.0, timesteps, steps, dtype=jnp.float32)
    alphas_cumprod = jnp.cos((x / timesteps + s) / (1 + s) * math.pi * 0.5) ** 2
    alphas_cumprod = alphas_cumprod / alphas_cumprod[0]
    betas = 1.0 - alphas_cumprod[1:] / alphas_cumprod[:-1]
    return jnp.clip(betas, 0.0, 0.999)


# ----------------------------------------------------------------------------
# Pallas kernel: diffusion training loss for one batch tile.
#
# perb_ref : (bt, 1, 2F+4)  = [ mu@Wc + b | sqrt_ac, sqrt_1m_ac, loss_w, 0 ]
# xin_ref  : (bt, S, 2D)    = [ x_start | noise ] packed on the lane dim
# wx_ref   : (D, 2F) bf16   fused trend|season input weights
# wfc_ref  : (F, D)  bf16   fc weight
# bfc_ref  : (1, D)  f32    fc bias
# f2_ref   : (2S, S) bf16   ff_weight * [cos ; -sin] / S  (forward-norm DFT)
# out_ref  : (1, 1, 128)    per-step partial weighted-loss sum (all lanes)
# ----------------------------------------------------------------------------
def _train_loss_kernel(perb_ref, xin_ref, wx_ref, wfc_ref, bfc_ref, f2_ref,
                       out_ref):
    bt, S, two_d = xin_ref.shape
    D = two_d // 2
    F2 = wx_ref.shape[1]
    F = wfc_ref.shape[0]

    perb = perb_ref[...]                       # (bt, 1, 2F+4) f32
    muc = perb[..., :F2]                       # (bt, 1, 2F): mu@Wc + b
    sa = perb[..., F2:F2 + 1]                  # (bt, 1, 1) sqrt_alphas_cumprod[t]
    s1m = perb[..., F2 + 1:F2 + 2]             # (bt, 1, 1) sqrt_1m_alphas_cumprod[t]
    lw = perb[..., F2 + 2:F2 + 3]              # (bt, 1, 1) loss_weight[t] (> 0)

    xin = xin_ref[...]                         # (bt, S, 2D) f32
    x0 = xin[..., :D]
    noise = xin[..., D:]

    # q_sample: x_t = sqrt(ac)*x0 + sqrt(1-ac)*noise
    x = sa * x0 + s1m * noise                  # (bt, S, D) f32

    # Fused trend|season linear layer; conditioning (constant over S) is a
    # per-batch broadcast add.  bf16 MXU operands, f32 accumulation.
    x2 = x.reshape(bt * S, D).astype(jnp.bfloat16)
    h = jnp.dot(x2, wx_ref[...], preferred_element_type=jnp.float32)   # (bt*S, 2F)
    h = h.reshape(bt, S, F2) + muc                                      # (bt, S, 2F)
    # TODO(synk): the real Diffusion-TS Transformer (multi-layer enc/dec with
    # trend/season decomposition + attention) was not provided; a two-branch
    # linear stand-in producing (trend, season) with identical shapes is used.
    ts = h[..., :F] + jnp.tanh(h[..., F:])                              # (bt, S, F)

    mo = jnp.dot(ts.reshape(bt * S, F).astype(jnp.bfloat16), wfc_ref[...],
                 preferred_element_type=jnp.float32)                    # (bt*S, D)
    mo = mo.reshape(bt, S, D) + bfc_ref[...]                            # (bt, S, D)

    # Weighted residual: lw > 0 so lw*|d| == |lw*d|, and lw / ff_weight fold
    # through the (linear) DFT exactly up to fp rounding.
    dw = lw * (mo - x0)                                                 # f32

    # L1 part (one cross-lane reduce).
    total = jnp.sum(jnp.abs(dw))

    # Fourier part: ONE lane-dense (2S, S) @ (S, bt*D) MXU matmul on the
    # seq-major residual (replaces bt narrow matmuls + serial scalar adds).
    if bt == 1:
        dwt = dw.reshape(S, D)
    else:
        dwt = jnp.swapaxes(dw, 0, 1).reshape(S, bt * D)
    fd = jnp.dot(f2_ref[...], dwt.astype(jnp.bfloat16),
                 preferred_element_type=jnp.float32)                    # (2S, bt*D)
    total = total + jnp.sum(jnp.abs(fd))

    out_ref[...] = jnp.full(out_ref.shape, total, dtype=jnp.float32)


def diffusion_ts_train_loss(x_start, noise, t, mu,
                            sqrt_alphas_cumprod, sqrt_one_minus_alphas_cumprod,
                            loss_weight, params, ff_weight, block_batch=None):
    B, S, D = x_start.shape
    F = params["wfc"].shape[0]
    F2 = 2 * F
    f32, bf16 = jnp.float32, jnp.bfloat16

    # Batch tile: aim for >=4 pipelined grid steps (and >=2 so v7x can shard
    # the parallel axis across its two TensorCores) while keeping each step a
    # reasonable tile; bt*D is the DFT matmul's lane width.
    if block_batch is None:
        bt = B
        for cand in (B // 8, B // 4, B // 2, 1):
            if cand >= 1 and B % cand == 0:
                bt = cand
                break
    else:
        bt = block_batch
    assert B % bt == 0
    G = B // bt

    # --- per-batch row: [mu @ Wc + b | sqrt_ac, sqrt_1m_ac, loss_w, 0] ------
    # (mu is constant over S, so its linear-layer contribution is computed
    #  once per batch element here instead of materializing mu over S rows.)
    wc = jnp.concatenate([params["wtr_c"], params["wse_c"]], axis=1)     # (E, 2F)
    bb = jnp.concatenate([params["btr"], params["bse"]], axis=1)         # (1, 2F)
    mucb = mu.astype(f32) @ wc.astype(f32) + bb.astype(f32)              # (B, 2F)
    coef = jnp.stack([sqrt_alphas_cumprod[t],
                      sqrt_one_minus_alphas_cumprod[t],
                      loss_weight[t],
                      jnp.zeros_like(loss_weight[t])], axis=-1)          # (B, 4)
    perb = jnp.concatenate([mucb, coef.astype(f32)], axis=-1)[:, None, :]  # (B,1,2F+4)

    # --- packed per-element stream: [x_start | noise] ------------------------
    xin = jnp.concatenate([x_start, noise], axis=-1).astype(f32)          # (B, S, 2D)

    # --- resident weights: bf16 MXU operands, f32 bias ------------------------
    wx = jnp.concatenate([params["wtr_x"], params["wse_x"]], axis=1).astype(bf16)  # (D,2F)
    wfc = params["wfc"].astype(bf16)                                       # (F, D)
    bfc = params["bfc"].astype(f32)                                        # (1, D)

    # Forward-normalized DFT over seq (torch.fft.fft(..., norm='forward')),
    # ff_weight folded in, real/imag stacked -> one (2S, S) operand.
    n = jnp.arange(S, dtype=f32)
    ang = 2.0 * math.pi * n[:, None] * n[None, :] / S
    f2 = ff_weight * jnp.concatenate([jnp.cos(ang) / S, -jnp.sin(ang) / S], axis=0)
    f2 = f2.astype(bf16)                                                   # (2S, S)

    # Constant-index-map weight blocks (wx, wfc, bfc, f2) stay resident across
    # the grid; only the per-batch streams are re-DMA'd each step.
    full = lambda a: pl.BlockSpec(a.shape, lambda g: (0,) * a.ndim)

    partials = pl.pallas_call(
        _train_loss_kernel,
        out_shape=jax.ShapeDtypeStruct((G, 1, 128), f32),
        grid_spec=pltpu.PrefetchScalarGridSpec(
            num_scalar_prefetch=0,
            grid=(G,),
            in_specs=[
                pl.BlockSpec((bt, 1, F2 + 4), lambda g: (g, 0, 0)),
                pl.BlockSpec((bt, S, 2 * D), lambda g: (g, 0, 0)),
                full(wx), full(wfc), full(bfc), full(f2),
            ],
            out_specs=pl.BlockSpec((1, 1, 128), lambda g: (g, 0, 0)),
        ),
        compiler_params=pltpu.CompilerParams(
            dimension_semantics=("parallel",),     # batch-tile axis: no carry
            vmem_limit_bytes=32 * 1024 * 1024),    # raise v5e 16 MiB default
    )(perb, xin, wx, wfc, bfc, f2)

    # train_loss = reduce(b ... -> b (...), 'mean') * loss_weight[t]; then .mean()
    return jnp.sum(partials[:, 0, 0]) / (B * S * D)


# ----------------------------------------------------------------------------
# Conditioning module (embedding lookups + small MLP) -- plain JAX glue.
# TODO(synk): exact ConditioningModule architecture was not provided; a
# per-variable embedding + linear heads producing (mu, logvar) is used.
# ----------------------------------------------------------------------------
def conditioning_module(cond_vars, cm_params):
    embs = [cm_params["emb"][name][idx] for name, idx in cond_vars.items()]
    h = jnp.concatenate(embs, axis=-1)
    h = jnp.tanh(h @ cm_params["W_h"] + cm_params["b_h"])
    mu = h @ cm_params["W_mu"] + cm_params["b_mu"]
    logvar = h @ cm_params["W_lv"] + cm_params["b_lv"]
    return mu, logvar


if __name__ == "__main__":
    # small config
    B, S, D, E = 2, 16, 4, 12          # batch, seq_len, input_dim, cond_emb_dim
    F = D + E                          # transformer feature width
    NUM_TIMESTEPS = 100
    categorical_dims = {"var_a": 5, "var_b": 7}
    ff_weight = math.sqrt(S) / 5.0     # default reg_weight

    key = jax.random.PRNGKey(0)
    keys = jax.random.split(key, 20)

    # diffusion schedule buffers (cosine schedule)
    betas = cosine_beta_schedule(NUM_TIMESTEPS)
    alphas = 1.0 - betas
    alphas_cumprod = jnp.cumprod(alphas)
    sqrt_alphas_cumprod = jnp.sqrt(alphas_cumprod)
    sqrt_one_minus_alphas_cumprod = jnp.sqrt(1.0 - alphas_cumprod)
    loss_weight = jnp.sqrt(alphas) * jnp.sqrt(1.0 - alphas_cumprod) / betas / 100.0

    # deterministic parameters
    def init(k, shape, fan_in):
        return jax.random.normal(k, shape, jnp.float32) / math.sqrt(fan_in)

    params = {
        "wtr_x": init(keys[0], (D, F), F), "wtr_c": init(keys[1], (E, F), F),
        "btr": jnp.zeros((1, F), jnp.float32),
        "wse_x": init(keys[2], (D, F), F), "wse_c": init(keys[3], (E, F), F),
        "bse": jnp.zeros((1, F), jnp.float32),
        "wfc": init(keys[4], (F, D), F),
        "bfc": jnp.zeros((1, D), jnp.float32),
    }
    n_vars = len(categorical_dims)
    cm_params = {
        "emb": {name: init(keys[5 + i], (n_cat, E), E)
                for i, (name, n_cat) in enumerate(categorical_dims.items())},
        "W_h": init(keys[8], (n_vars * E, E), n_vars * E),
        "b_h": jnp.zeros((E,), jnp.float32),
        "W_mu": init(keys[9], (E, E), E), "b_mu": jnp.zeros((E,), jnp.float32),
        "W_lv": init(keys[10], (E, E), E), "b_lv": jnp.zeros((E,), jnp.float32),
    }

    # inputs
    x_start = jax.random.normal(keys[11], (B, S, D), jnp.float32)
    t = jax.random.randint(keys[12], (B,), 0, NUM_TIMESTEPS)
    noise = jax.random.normal(keys[13], (B, S, D), jnp.float32)
    cond_vars = {
        "var_a": jax.random.randint(keys[14], (B,), 0, categorical_dims["var_a"]),
        "var_b": jax.random.randint(keys[15], (B,), 0, categorical_dims["var_b"]),
    }

    # conditioning (mu, logvar) -- glue
    mu, logvar = conditioning_module(cond_vars, cm_params)

    loss = diffusion_ts_train_loss(
        x_start, noise, t, mu,
        sqrt_alphas_cumprod, sqrt_one_minus_alphas_cumprod, loss_weight,
        params, ff_weight)

    loss, mu, logvar = jax.block_until_ready((loss, mu, logvar))
    assert jnp.isfinite(loss)
    print("KERNEL_OK")
</pallas_src>

<mosaic_0001>
module attributes {stable_mosaic.version = 11 : i64} {
  func.func @_train_loss_kernel(%arg0: i32, %arg1: memref<1x1x36xf32, #tpu.memory_space<vmem>>, %arg2: memref<1x16x8xf32, #tpu.memory_space<vmem>>, %arg3: memref<4x32xbf16, #tpu.memory_space<vmem>>, %arg4: memref<16x4xbf16, #tpu.memory_space<vmem>>, %arg5: memref<1x4xf32, #tpu.memory_space<vmem>>, %arg6: memref<32x16xbf16, #tpu.memory_space<vmem>>, %arg7: memref<1x1x128xf32, #tpu.memory_space<vmem>>) attributes {dimension_semantics = [#tpu.dimension_semantics<parallel>], iteration_bounds = array<i64: 2>, scalar_prefetch = 0 : i64, scratch_operands = 0 : i64, tpu.core_type = #tpu.core_type<tc>, window_params = [{transform_indices = @transform_0, window_bounds = array<i64: 1, 1, 36>}, {transform_indices = @transform_1, window_bounds = array<i64: 1, 16, 8>}, {pipeline_mode = #tpu.pipeline_mode<synchronous>, transform_indices = @transform_2, window_bounds = array<i64: 4, 32>}, {pipeline_mode = #tpu.pipeline_mode<synchronous>, transform_indices = @transform_3, window_bounds = array<i64: 16, 4>}, {pipeline_mode = #tpu.pipeline_mode<synchronous>, transform_indices = @transform_4, window_bounds = array<i64: 1, 4>}, {pipeline_mode = #tpu.pipeline_mode<synchronous>, transform_indices = @transform_5, window_bounds = array<i64: 32, 16>}, {transform_indices = @transform_6, window_bounds = array<i64: 1, 1, 128>}]} {
    %c0 = arith.constant 0 : index
    %c0_0 = arith.constant 0 : index
    %c0_1 = arith.constant 0 : index
    %0 = vector.load %arg1[%c0, %c0_0, %c0_1] : memref<1x1x36xf32, #tpu.memory_space<vmem>>, vector<1x1x36xf32>
    %1 = vector.extract_strided_slice %0 {offsets = [0, 0, 0], sizes = [1, 1, 32], strides = [1, 1, 1]} : vector<1x1x36xf32> to vector<1x1x32xf32>
    %2 = vector.extract_strided_slice %0 {offsets = [0, 0, 32], sizes = [1, 1, 1], strides = [1, 1, 1]} : vector<1x1x36xf32> to vector<1x1x1xf32>
    %3 = vector.extract_strided_slice %0 {offsets = [0, 0, 33], sizes = [1, 1, 1], strides = [1, 1, 1]} : vector<1x1x36xf32> to vector<1x1x1xf32>
    %4 = vector.extract_strided_slice %0 {offsets = [0, 0, 34], sizes = [1, 1, 1], strides = [1, 1, 1]} : vector<1x1x36xf32> to vector<1x1x1xf32>
    %c0_2 = arith.constant 0 : index
    %c0_3 = arith.constant 0 : index
    %c0_4 = arith.constant 0 : index
    %5 = vector.load %arg2[%c0_2, %c0_3, %c0_4] : memref<1x16x8xf32, #tpu.memory_space<vmem>>, vector<1x16x8xf32>
    %6 = vector.extract_strided_slice %5 {offsets = [0, 0, 0], sizes = [1, 16, 4], strides = [1, 1, 1]} : vector<1x16x8xf32> to vector<1x16x4xf32>
    %7 = vector.extract_strided_slice %5 {offsets = [0, 0, 4], sizes = [1, 16, 4], strides = [1, 1, 1]} : vector<1x16x8xf32> to vector<1x16x4xf32>
    %8 = vector.broadcast %2 : vector<1x1x1xf32> to vector<1x16x4xf32>
    %9 = arith.mulf %8, %6 : vector<1x16x4xf32>
    %10 = vector.broadcast %3 : vector<1x1x1xf32> to vector<1x16x4xf32>
    %11 = arith.mulf %10, %7 : vector<1x16x4xf32>
    %12 = arith.addf %9, %11 : vector<1x16x4xf32>
    %13 = vector.shape_cast %12 : vector<1x16x4xf32> to vector<16x4xf32>
    %14 = arith.truncf %13 : vector<16x4xf32> to vector<16x4xbf16>
    %c0_5 = arith.constant 0 : index
    %c0_6 = arith.constant 0 : index
    %15 = vector.load %arg3[%c0_5, %c0_6] : memref<4x32xbf16, #tpu.memory_space<vmem>>, vector<4x32xbf16>
    %cst = arith.constant dense<0.000000e+00> : vector<16x32xf32>
    %16 = tpu.matmul %14, %15, %cst {dimension_numbers = #tpu.dot_dimension_numbers<[1], [0], [0], [1], [0, 0, 1, 1], [], []>} : vector<16x4xbf16>, vector<4x32xbf16>, vector<16x32xf32> -> vector<16x32xf32>
    %17 = vector.shape_cast %16 : vector<16x32xf32> to vector<1x16x32xf32>
    %18 = vector.broadcast %1 : vector<1x1x32xf32> to vector<1x16x32xf32>
    %19 = arith.addf %17, %18 : vector<1x16x32xf32>
    %20 = vector.extract_strided_slice %19 {offsets = [0, 0, 0], sizes = [1, 16, 16], strides = [1, 1, 1]} : vector<1x16x32xf32> to vector<1x16x16xf32>
    %21 = vector.extract_strided_slice %19 {offsets = [0, 0, 16], sizes = [1, 16, 16], strides = [1, 1, 1]} : vector<1x16x32xf32> to vector<1x16x16xf32>
    %22 = math.tanh %21 : vector<1x16x16xf32>
    %23 = arith.addf %20, %22 : vector<1x16x16xf32>
    %24 = vector.shape_cast %23 : vector<1x16x16xf32> to vector<16x16xf32>
    %25 = arith.truncf %24 : vector<16x16xf32> to vector<16x16xbf16>
    %c0_7 = arith.constant 0 : index
    %c0_8 = arith.constant 0 : index
    %26 = vector.load %arg4[%c0_7, %c0_8] : memref<16x4xbf16, #tpu.memory_space<vmem>>, vector<16x4xbf16>
    %cst_9 = arith.constant dense<0.000000e+00> : vector<16x4xf32>
    %27 = tpu.matmul %25, %26, %cst_9 {dimension_numbers = #tpu.dot_dimension_numbers<[1], [0], [0], [1], [0, 0, 1, 1], [], []>} : vector<16x16xbf16>, vector<16x4xbf16>, vector<16x4xf32> -> vector<16x4xf32>
    %28 = vector.shape_cast %27 : vector<16x4xf32> to vector<1x16x4xf32>
    %c0_10 = arith.constant 0 : index
    %c0_11 = arith.constant 0 : index
    %29 = vector.load %arg5[%c0_10, %c0_11] : memref<1x4xf32, #tpu.memory_space<vmem>>, vector<1x4xf32>
    %30 = vector.shape_cast %29 : vector<1x4xf32> to vector<1x1x4xf32>
    %31 = vector.broadcast %30 : vector<1x1x4xf32> to vector<1x16x4xf32>
    %32 = arith.addf %28, %31 : vector<1x16x4xf32>
    %33 = arith.subf %32, %6 : vector<1x16x4xf32>
    %34 = vector.broadcast %4 : vector<1x1x1xf32> to vector<1x16x4xf32>
    %35 = arith.mulf %34, %33 : vector<1x16x4xf32>
    %36 = math.absf %35 : vector<1x16x4xf32>
    %37 = vector.shape_cast %36 : vector<1x16x4xf32> to vector<1x1x16x4xf32>
    %cst_12 = arith.constant dense<0.000000e+00> : vector<1xf32>
    %38 = vector.multi_reduction <add>, %37, %cst_12 [1, 2, 3] : vector<1x1x16x4xf32> to vector<1xf32>
    %39 = vector.shape_cast %38 : vector<1xf32> to vector<1x1x1x1xf32>
    %40 = vector.extract %39[0, 0, 0, 0] : f32 from vector<1x1x1x1xf32>
    %41 = vector.shape_cast %35 : vector<1x16x4xf32> to vector<16x4xf32>
    %c0_13 = arith.constant 0 : index
    %c0_14 = arith.constant 0 : index
    %42 = vector.load %arg6[%c0_13, %c0_14] : memref<32x16xbf16, #tpu.memory_space<vmem>>, vector<32x16xbf16>
    %43 = arith.truncf %41 : vector<16x4xf32> to vector<16x4xbf16>
    %cst_15 = arith.constant dense<0.000000e+00> : vector<32x4xf32>
    %44 = tpu.matmul %42, %43, %cst_15 {dimension_numbers = #tpu.dot_dimension_numbers<[1], [0], [0], [1], [0, 0, 1, 1], [], []>} : vector<32x16xbf16>, vector<16x4xbf16>, vector<32x4xf32> -> vector<32x4xf32>
    %45 = math.absf %44 : vector<32x4xf32>
    %46 = vector.shape_cast %45 : vector<32x4xf32> to vector<1x32x4xf32>
    %cst_16 = arith.constant dense<0.000000e+00> : vector<1xf32>
    %47 = vector.multi_reduction <add>, %46, %cst_16 [1, 2] : vector<1x32x4xf32> to vector<1xf32>
    %48 = vector.shape_cast %47 : vector<1xf32> to vector<1x1x1xf32>
    %49 = vector.extract %48[0, 0, 0] : f32 from vector<1x1x1xf32>
    %50 = arith.addf %40, %49 : f32
    %51 = vector.broadcast %50 : f32 to vector<1x1x128xf32>
    %c0_17 = arith.constant 0 : index
    %c0_18 = arith.constant 0 : index
    %c0_19 = arith.constant 0 : index
    %52 = vector.load %arg7[%c0_17, %c0_18, %c0_19] : memref<1x1x128xf32, #tpu.memory_space<vmem>>, vector<1x1x128xf32>
    tpu.vector_store %arg7[%c0_17, %c0_18, %c0_19], %51 {strides = array<i32>} : memref<1x1x128xf32, #tpu.memory_space<vmem>>, vector<1x1x128xf32>,
    return
  }
  func.func @transform_0(%arg0: i32) -> (i32, i32, i32) {
    %c0_i32 = arith.constant 0 : i32
    %c0_i32_0 = arith.constant 0 : i32
    %c0_i32_1 = arith.constant 0 : i32
    return %arg0, %c0_i32, %c0_i32_0 : i32, i32, i32
  }
  func.func @transform_1(%arg0: i32) -> (i32, i32, i32) {
    %c0_i32 = arith.constant 0 : i32
    %c0_i32_0 = arith.constant 0 : i32
    %c0_i32_1 = arith.constant 0 : i32
    return %arg0, %c0_i32, %c0_i32_0 : i32, i32, i32
  }
  func.func @transform_2(%arg0: i32) -> (i32, i32) {
    %c0_i32 = arith.constant 0 : i32
    %c0_i32_0 = arith.constant 0 : i32
    %c0_i32_1 = arith.constant 0 : i32
    return %c0_i32, %c0_i32_0 : i32, i32
  }
  func.func @transform_3(%arg0: i32) -> (i32, i32) {
    %c0_i32 = arith.constant 0 : i32
    %c0_i32_0 = arith.constant 0 : i32
    %c0_i32_1 = arith.constant 0 : i32
    return %c0_i32, %c0_i32_0 : i32, i32
  }
  func.func @transform_4(%arg0: i32) -> (i32, i32) {
    %c0_i32 = arith.constant 0 : i32
    %c0_i32_0 = arith.constant 0 : i32
    %c0_i32_1 = arith.constant 0 : i32
    return %c0_i32, %c0_i32_0 : i32, i32
  }
  func.func @transform_5(%arg0: i32) -> (i32, i32) {
    %c0_i32 = arith.constant 0 : i32
    %c0_i32_0 = arith.constant 0 : i32
    %c0_i32_1 = arith.constant 0 : i32
    return %c0_i32, %c0_i32_0 : i32, i32
  }
  func.func @transform_6(%arg0: i32) -> (i32, i32, i32) {
    %c0_i32 = arith.constant 0 : i32
    %c0_i32_0 = arith.constant 0 : i32
    %c0_i32_1 = arith.constant 0 : i32
    return %arg0, %c0_i32, %c0_i32_0 : i32, i32, i32
  }
}

</mosaic_0001>

<bundles_post_ra>
// kernel: tpu_custom_call.1
= control target key start
LH: loop header
LB: loop body
LE: loop exit
PB: predicated region body
PF: predicated region fallthrough
CT: control target
= control target key end

     0   :  { %11 = vsyncpa [#allocation3], 0  ;;  %s955_s0 = inlined_call_operand.vmem [shape: f32[2,1,36], index: 0, kind: input, shape index: {}]   ;;  %s956_s1 = inlined_call_operand.vmem [shape: f32[2,16,8], index: 1, kind: input, shape index: {}]   ;;  %s957_s2 = inlined_call_operand.vmem [shape: bf16[4,32], index: 2, kind: input, shape index: {}]   ;;  %s958_s3 = inlined_call_operand.vmem [shape: bf16[16,4], index: 3, kind: input, shape index: {}]   ;;  %s959_s4 = inlined_call_operand.vmem [shape: f32[1,4], index: 4, kind: input, shape index: {}]   ;;  %s960_s5 = inlined_call_operand.vmem [shape: bf16[32,16], index: 5, kind: input, shape index: {}]   ;;  %s961_s6 = inlined_call_operand.hbm [shape: f32[2,1,128], index: 6, kind: output, shape index: {}]  }
   0x1   :  { %13 = vsyncpa [#allocation3 + $0x1], 0  ;;  %s827_s21 = smov 0   ;;  %s829_s22 = smov 0  }
   0x2   :  { %s831_s23 = smov 0   ;;  %s833_s24 = smov 0  }
   0x3 LB: > { %s848_s25 = sadd.s32 4294967295, %s782_s24   ;;  %s615_s26 = sadd.s32 4294967294, %s782_s24   ;;  %s782_s24 = sphi %s833_s24, %s967_s24   ;;  %s778_s23 = sphi %s831_s23, %s966_s23   ;;  %s774_s22 = sphi %s829_s22, %s965_s22   ;;  %s770_s21 = sphi %s827_s21, %s964_s21  }
   0x4   : > { %s852_s27 = sadd.s32 1, %s782_s24   ;;  %s162_s28 = sadd.s32 1, %s778_s23 }
   0x5   : > { %s159_s29 = ssub.s32 %s782_s24, %s852_s27  ;;  %p172_p0 = scmp.ne.s32.totalorder %s778_s23, %s774_s22 }
   0x6   : > { %p160_p1 = scmp.eq.s32.totalorder %s159_s29, 0  ;;  %p173_p2 = scmp.eq.s32.totalorder %s848_s25, 1 }
   0x7   : > { %p178_p3 = scmp.ne.s32.totalorder %s774_s22, %s770_s21  ;;  %p179_p4 = scmp.eq.s32.totalorder %s615_s26, 1 }
   0x8   : > { %s863_s30 = scalar_select %p160_p1, %s778_s23, %s162_s28  }
   0x9   : > { %p865_p5 = por %p173_p2, %p172_p0  ;;  %p869_p6 = por %p179_p4, %p178_p3 }
   0xa   : > { %p618_p7 = scmp.ge.s32.totalorder %s782_s24, 1  ;;  %p223_p8 = scmp.lt.s32.totalorder %s782_s24, 3 }
   0xc   : > { %p224_p9 = pnand %p618_p7, %p223_p8 }
   0xd   : > { %p255_p10 = scmp.lt.s32.totalorder (!%p224_p9), %s848_s25, 1  ;;  %v784_v0 = vmov (!%p224_p9), 33   ;;  %v785_v2 = vmov (!%p224_p9), 32   ;;  %v295_v3 = vld [vmem:[%s957_s2] sm:$0x3] (!%p224_p9)  ;;  %vm300_vm0 = vcmask (!%p224_p9), 1041408  }
   0xe   : > { %227 = sbr.rel (%p224_p9) target bundleno = 1295 (0x50f), region = 44  ;;  %709 = vset.pattern.permute.xlu0 (!%p224_p9), %v784_v0  ;;  %v786_v4 = vmov (!%p224_p9), 0.0   ;;  %v302_v5 = vsel (!%p224_p9), %vm300_vm0, %v295_v3, 0  ;;  %vm787_vm1 = vmmov (!%p224_p9), 0   ;;  %s788_s19 = smov (!%p224_p9), 124   ;;  %vm296_vm2 = vcmask (!%p224_p9), 31744  }
   0xf   : > { %641 = vmatprep.subr.bf16.mxu0 (!%p224_p9), %v786_v4  ;;  %647 = vmatprep.subr.bf16.mxu1 (!%p224_p9), %v786_v4  ;;  %v713_v23 = vld [vmem:[%s958_s3] sm:$0xff] (!%p224_p9)   ;;  %v789_v26 = vmov (!%p224_p9), 34   ;;  %s790_s28 = smov (!%p224_p9), 112   ;;  %vm369_vm3 = vcmask (!%p224_p9), 130048   ;;  %v715_v52 = vld [vmem:[%s960_s5 + $0x8] sm:$0xff] (!%p224_p9)   ;;  %s253_s14 = sand.u32 (!%p224_p9), 1, %s774_s22  }
  0x10   : > { %642 = vmatpush3.bf16.msra.mxu0 (!%p224_p9), %v302_v5  ;;  %643 = vmatprep.mubr.msk.bf16.mxu0 (!%p224_p9), %vm787_vm1, %v786_v4  ;;  %v714_v34 = vld [vmem:[%s960_s5] sm:$0xff] (!%p224_p9)   ;;  %s630_s16 = sshll.u32 (!%p224_p9), %s848_s25, 4  ;;  %s254_s17 = scalar_lea.vmem (!%p224_p9), [#allocation2], %s253_s14 }
  0x11   : > { %649 = vmatprep.mubr.msk.bf16.mxu1 (!%p224_p9), %vm787_vm1, %v786_v4  ;;  %648 = vmatpush3.bf16.msra.mxu1 (!%p224_p9), %v713_v23  ;;  %v625_v35 = vld [vmem:[%s959_s4] ss:$0 sm:$0xff] (!%p224_p9)  ;;  %s913_s29 = scalar_lea.hbm (!%p224_p9), %s961_s6, %s630_s16 }
  0x12   : > { %711 = vset.pattern.permute.xlu1 (!%p224_p9), %v789_v26 }
  0x15   : > { %s256_s9 = scalar_select %p255_p10, %s848_s25, 1 }
  0x16   : > { %s791_s25 = smov [#allocation2]  }
  0x17   : > { %s257_s12 = scalar_lea.vmem %s955_s0, %s256_s9  ;;  %s633_s13 = sshll.u32 %s256_s9, 4 }
  0x18   : > { %v621_v1 = vld [vmem:[%s257_s12] ss:$0 sm:$0xff]  ;;  %s262_s18 = scalar_lea.vmem %s956_s1, %s633_s13  ;;  %s539_s9 = scalar_lea.sflag [#allocation3], %s253_s14 }
  0x19   : > { %279 = vperm.xlu0 %709, %v621_v1   ;;  %v265_v6 = vld [vmem:[%s262_s18] sm:$0xff]  ;;  %v266_v9 = vld [vmem:[%s262_s18 + $0x8] sm:$0xff]  ;;  %s551_s18 = sshll.u32 %s254_s17, 4  ;;  %s724_s11 = sshll.u32 %s791_s25, 4  ;;  %s915_s18 = int_to_ptr.vmem [resolvable:$true] %s551_s18  ;;  %s725_s11 = int_to_ptr.vmem [resolvable:$false] %s724_s11 }
  0x1a   : > { %s720_s10 = scalar_lea.vmem %s915_s18, 16  ;;  %s726_s12 = scalar_lea.vmem %s725_s11, 32 }
  0x1b   : > { %p721_p11 = scmp.ne.s32.totalorder %s915_s18, %s720_s10  ;;  %p727_p0 = scmp.lt.s32.totalorder %s915_s18, %s725_s11 }
  0x1c   : > { %p728_p1 = scmp.lt.s32.totalorder %s726_s12, %s720_s10 }
  0x1d   : > { %710 = vset.pattern.permute.xlu0 %v785_v2  ;;  %p722_p12 = pnand %p721_p11, %p865_p5 }
  0x1e   : > { %273 = vperm.xlu0 %710, %v621_v1   ;;  %p729_p2 = por %p728_p1, %p727_p0 }
  0x1f   : > { %p723_p13 = pneg %p722_p12 }
  0x21   : > { %p730_p3 = pnand %p729_p2, %p723_p13 }
  0x22   : > { %712 = vset.pattern.permute.xlu0 %v789_v26 }
  0x98   : > { %v280_v7 = vpop.permute.xlu0 %279 }
  0x99   : > { %v282_v8 = vmul.f32 %v280_v7, %v265_v6  ;;  %v283_v10 = vmul.f32 %v280_v7, %v266_v9 }
  0x9b   : > { %286 = vrot.lane.b32.xlu1 %v282_v8, %s788_s19 }
  0x9d   : > { %v274_v11 = vpop.permute.xlu0 %273 }
  0x9e   : > { %v276_v13 = vmul.f32 %v274_v11, %v265_v6  ;;  %v277_v14 = vmul.f32 %v274_v11, %v266_v9 }
  0x9f   : > { %288 = vrot.lane.b32.xlu1 %v283_v10, %s788_s19 }
 0x10d   : > { %v287_v12 = vpop.permute.xlu1 %286 }
 0x10e   : > { %v292_v16 = vadd.f32 %v287_v12, %v276_v13 }
 0x111   : > { %v289_v15 = vpop.permute.xlu1 %288 }
 0x112   : > { %v293_v17 = vadd.f32 %v289_v15, %v277_v14 }
 0x114   : > { %v294_v18 = vpack.c.bf16 %v293_v17, %v292_v16 }
 0x116   : > { %644 = vmatmul.mubr.msk.bf16.vlgmr.msra.gmra.mrb[0].mxu0 %vm296_vm2, %v294_v18 }
 0x117   : > { %655 = vmatprep.mubr.msk.bf16.mxu0 %vm369_vm3, %v714_v34 }
 0x1e9   : > { %v338_v19 = vpop.f32.mrb[0].mxu0 }
 0x1ea   : > { %v346_v20 = vadd.f32 %v621_v1, %v338_v19  ;;  %v645_v21 = vpop.f32.mrb[1].mxu0 }
 0x1eb   : > { %v341_v22 = vpop.f32.mrb[2].mxu0 }
 0x1ec   : > { %716 = vtanh.f32 %v346_v20  ;;  %v347_v24 = vadd.f32 %v621_v1, %v341_v22  ;;  %v646_v25 = vpop.f32.mrb[3].mxu0 }
 0x1ee   : > { %718 = vtanh.f32 %v347_v24 }
 0x1f6   : > { %v717_v27 = vpop.eup %716 }
 0x1f7   : > { %352 = vrot.lane.b32.xlu1 %v717_v27, %s790_s28 }
 0x1f8   : > { %v719_v28 = vpop.eup %718 }
 0x1f9   : > { %354 = vrot.lane.b32.xlu0 %v719_v28, %s790_s28 }
 0x1fb   : > { %426 = vperm.xlu1 %711, %v621_v1  }
 0x269   : > { %v353_v29 = vpop.permute.xlu1 %352 }
 0x26a   : > { %v358_v31 = vadd.f32 %v353_v29, %v346_v20 }
 0x26b   : > { %v355_v30 = vpop.permute.xlu0 %354 }
 0x26c   : > { %v359_v32 = vadd.f32 %v355_v30, %v347_v24 }
 0x26e   : > { %v360_v33 = vpack.c.bf16 %v359_v32, %v358_v31 }
 0x270   : > { %650 = vmatmul.mubr.msk.bf16.vlgmr.msra.gmra.mrb[0].mxu1 %vm369_vm3, %v360_v33 }
 0x27a   : > { %v427_v40 = vpop.permute.xlu1 %426 }
 0x343   : > { %v407_v36 = vpop.f32.mrb[0].mxu1 }
 0x344   : > { %v421_v37 = vadd.f32 %v625_v35, %v407_v36  ;;  %v651_v38 = vpop.f32.mrb[1].mxu1 }
 0x345   : > { %v410_v39 = vpop.f32.mrb[2].mxu1 }
 0x346   : > { %v423_v41 = vsub.f32 %v421_v37, %v265_v6  ;;  %v422_v42 = vadd.f32 %v625_v35, %v410_v39  ;;  %v652_v43 = vpop.f32.mrb[3].mxu1 }
 0x348   : > { %v424_v44 = vsub.f32 %v422_v42, %v266_v9  ;;  %v429_v45 = vmul.f32 %v427_v40, %v423_v41 }
 0x34a   : > { %v430_v46 = vmul.f32 %v427_v40, %v424_v44  ;;  %v431_v47 = vand.u32 2147483647, %v429_v45 }
 0x34c   : > { %v432_v48 = vand.u32 2147483647, %v430_v46  ;;  %v449_v49 = vpack.c.bf16 %v430_v46, %v429_v45  ;;  %v433_v50 = vsel %vm296_vm2, %v431_v47, 0.0 }
 0x34e   : > { %653 = vmatprep.subr.bf16.mxu0 %v449_v49  ;;  %v434_v51 = vsel %vm296_vm2, %v432_v48, 0.0 }
 0x34f   : > { %654 = vmatpush3.bf16.msra.mxu0 %v449_v49  ;;  %v435_v53 = vadd.f32 %v434_v51, %v433_v50 }
 0x351   : > { %436 = vadd.xlane.f32.xlu0 %v435_v53 }
 0x352   : > { %656 = vmatmul.mubr.msk.bf16.vlgmr.msra.gmra.mrb[4].mxu0 %vm369_vm3, %v715_v52 }
 0x3de   : > { %v437_v54 = vpop.xlane.xlu0 %436 }
 0x3df   : > { %v438_v55 = vrot.slane %v437_v54, 4 }
 0x3e1   : > { %v439_v56 = vadd.f32 %v438_v55, %v437_v54 }
 0x3e3   : > { %v440_v57 = vrot.slane %v439_v56, 2 }
 0x3e5   : > { %v441_v58 = vadd.f32 %v440_v57, %v439_v56 }
 0x3e7   : > { %v442_v59 = vrot.slane %v441_v58, 1 }
 0x3e9   : > { %v443_v60 = vadd.f32 %v442_v59, %v441_v58 }
 0x3eb   : > { %659 = vpush %v443_v60 }
 0x41c   : > { %s660_s15 = spop %659 }
 0x425   : > { %v657_v61 = vpop.f32.mrb[4].mxu0 }
 0x426   : > { %v500_v62 = vpop.f32.mrb[5].mxu0  ;;  %v517_v2 = vand.u32 2147483647, %v657_v61 }
 0x427   : > { %v515_v63 = vand.u32 2147483647, %v500_v62  ;;  %v658_v0 = vpop.f32.mrb[6].mxu0 }
 0x428   : > { %v503_v1 = vpop.f32.mrb[7].mxu0  ;;  %v518_v5 = vand.u32 2147483647, %v658_v0  ;;  %v522_v8 = vsel %vm296_vm2, %v517_v2, 0.0 }
 0x429   : > { %v516_v3 = vand.u32 2147483647, %v503_v1  ;;  %v519_v4 = vsel %vm296_vm2, %v515_v63, 0.0 }
 0x42a   : > { %v524_v10 = vsel %vm296_vm2, %v518_v5, 0.0 }
 0x42b   : > { %v520_v6 = vsel %vm296_vm2, %v516_v3, 0.0 }
 0x42c   : > { %v521_v7 = vadd.f32 %v520_v6, %v519_v4 }
 0x42e   : > { %v523_v9 = vadd.f32 %v522_v8, %v521_v7 }
 0x430   : > { %v525_v11 = vadd.f32 %v524_v10, %v523_v9 }
 0x432   : > { %526 = vadd.xlane.f32.xlu1 %v525_v11 }
 0x4bf   : > { %v527_v12 = vpop.xlane.xlu1 %526 }
 0x4c0   : > { %v528_v13 = vrot.slane %v527_v12, 4 }
 0x4c2   : > { %v529_v14 = vadd.f32 %v528_v13, %v527_v12 }
 0x4c4   : > { %v530_v15 = vrot.slane %v529_v14, 2 }
 0x4c6   : > { %v531_v16 = vadd.f32 %v530_v15, %v529_v14 }
 0x4c8   : > { %v532_v17 = vrot.slane %v531_v16, 1 }
 0x4ca   : > { %v533_v18 = vadd.f32 %v532_v17, %v531_v16 }
 0x4cc   : > { %661 = vpush %v533_v18 }
 0x4fd   : > { %s662_s19 = spop %661 }
 0x4fe   : > { %s535_s20 = sadd.f32 %s662_s19, %s660_s15 }
 0x500   : > { %v536_v19 = vstv %s535_s20 }
 0x501   : > { %537 = vst [vmem:[%s254_s17] sm:$0x1] %v536_v19 }
 0x502   : > { %733 = shalt.err (!%p730_p3)
}
 0x503   : > { %s734_s13 = scalar_lea.hbm %s913_s29, 16  ;;  %s738_s16 = scalar_lea.hbm %s961_s6, 32 }
 0x504   : > { %p735_p4 = scmp.ne.s32.totalorder %s913_s29, %s734_s13  ;;  %p739_p9 = scmp.lt.u32.totalorder %s913_s29, %s961_s6 }
 0x505   : > { %p740_p10 = scmp.lt.u32.totalorder %s738_s16, %s734_s13  ;;  %p742_p12 = scmp.lt.u32.totalorder %s734_s13, %s913_s29 }
 0x506   : > { %p736_p7 = pnand %p735_p4, %p865_p5 }
 0x507   : > { %p741_p11 = por %p740_p10, %p739_p9 }
 0x508   : > { %p737_p8 = pneg %p736_p7 }
 0x509   : > { %p743_p13 = por %p742_p12, %p741_p11 }
 0x50b   : > { %p744_p0 = pnand %p743_p13, %p737_p8 }
 0x50d   : > { %747 = shalt.err (!%p744_p0)
}
 0x50e   : > { %663 = dma.vmem_to_hbm [thread:$0]  (%p865_p5), %s915_s18, 16, %s913_s29, %s539_s9  }
 0x50f PF: > { %p669_p1 = scmp.ge.s32.totalorder %s782_s24, 2  ;;  %s563_s20 = sand.u32 1, %s770_s21  }
 0x510   : > { %s564_s26 = scalar_lea.sflag [#allocation3], %s563_s20 }
 0x511   : > { %p666_p2 = pnand %p669_p1, %p869_p6 }
 0x513   : > { %765 = dma.done.wait (!%p666_p2), %s564_s26, 16  }
 0x514   : > { %767 = vsyncadd (!%p666_p2), %s564_s26, 4294967280  ;;  %p16_p3 = scmp.ge.s32.totalorder %s852_s27, 4   ;;  %s964_s21 = smov %s774_s22 }
 0x515   : > { %s965_s22 = smov %s778_s23  ;;  %s966_s23 = smov %s863_s30 }
 0x516   : > { %s967_s24 = smov %s852_s27  ;;  %18 = sbr.rel (!%p16_p3) target bundleno = 3 (0x3), region = 82 }
 0x51d   :  { %568 = vsyncpa [#allocation3], 1 }
 0x51e   :  { %570 = vsyncpa [#allocation3 + $0x1], 1 }

</bundles_post_ra>
